<compile_context>
chip_gen: v7x
topology: tpu7x:2x2x1
jax: 0.10.0
libtpu: 0.0.40
codegen_flags: <defaults>
</compile_context>

<pallas_src>
import jax
import jax.numpy as jnp
from jax.experimental import pallas as pl
from jax.experimental.pallas import tpu as pltpu


def _chomp_copy_kernel(x_ref, o_ref):
    # x_ref / o_ref: identical (r_tile, l_tile) VMEM windows at the same
    # element offset.  The chomp happens entirely in the BlockSpec mapping:
    # the trailing `chomp_size` columns are never mapped into any output block.
    o_ref[...] = x_ref[...]


def _round_up(v: int, m: int) -> int:
    return ((v + m - 1) // m) * m


def chomp1d(x: jax.Array, chomp_size: int, *,
            target_tile_bytes: int = 8 * 1024 * 1024) -> jax.Array:
    """Pallas equivalent of Chomp1d(chomp_size)(x) for x of shape (N, C, L)."""
    if chomp_size <= 0:
        # Documented divergence: PyTorch x[:, :, :-0] would return an empty
        # tensor; that degenerate case is rejected here instead.
        raise ValueError("chomp_size must be > 0")
    n, c, l = x.shape
    l_out = l - chomp_size
    if l_out <= 0:
        raise ValueError("chomp_size must be smaller than the sequence length")

    itemsize = jnp.dtype(x.dtype).itemsize

    # Flatten batch x channel into one row axis (free: row-major, last dim
    # contiguous).  All tiling happens on the fused (rows, L) view.
    rows = n * c
    x2 = x.reshape(rows, l)

    # Lane (last-dim) tile: multiple of 128 for unmasked stores on bulk
    # blocks, capped at 2048 and at the rounded-up output length.
    l_tile = min(2048, _round_up(l_out, 128))

    # Sublane packing for this dtype: 8 rows/vreg for 32-bit, 16 for 16-bit,
    # 32 for 8-bit.
    packing = max(8, 32 // itemsize)

    # Row tile: keep each VMEM buffer around target_tile_bytes.
    max_rows = max(1, target_tile_bytes // (l_tile * itemsize))
    if rows <= max_rows:
        r_tile = rows                                    # full extent: always legal
    else:
        r_tile = max(packing, (max_rows // packing) * packing)

    # Row-tile axis leading (better megacore balance on v7x), both parallel.
    grid = (pl.cdiv(rows, r_tile), pl.cdiv(l_out, l_tile))

    # Identical block shape + index_map for input and output: the input's
    # chomped tail is never addressed except as edge-masked slack of the final
    # partial L block, which is never stored.
    block_spec = pl.BlockSpec((r_tile, l_tile), lambda ri, li: (ri, li))

    bytes_accessed = 2 * rows * l_out * itemsize

    out2 = pl.pallas_call(
        _chomp_copy_kernel,
        out_shape=jax.ShapeDtypeStruct((rows, l_out), x.dtype),
        grid_spec=pltpu.PrefetchScalarGridSpec(
            num_scalar_prefetch=0,
            grid=grid,
            in_specs=[block_spec],
            out_specs=block_spec,
        ),
        compiler_params=pltpu.CompilerParams(
            dimension_semantics=("parallel", "parallel"),
            vmem_limit_bytes=48 * 1024 * 1024,
        ),
        cost_estimate=pl.CostEstimate(
            flops=0, transcendentals=0, bytes_accessed=bytes_accessed),
    )(x2)

    # TODO(synk): in a full TCN, fuse the chomp into the producing conv's
    # out_spec (only write L_out columns) and delete this standalone pass.
    return out2.reshape(n, c, l_out)


if __name__ == "__main__":
    key = jax.random.PRNGKey(0)

    # Small shape consistent with a TCN block: batch=2, channels=4, length=16.
    N, C, L = 2, 4, 16
    chomp_size = 3
    x = jax.random.normal(key, (N, C, L), dtype=jnp.float32)

    y = jax.block_until_ready(chomp1d(x, chomp_size))
    y_ref = x[:, :, :-chomp_size]
    assert y.shape == (N, C, L - chomp_size), y.shape
    assert y.dtype == x.dtype
    assert jnp.array_equal(y, y_ref), "Pallas Chomp1d output mismatch (f32)"

    # Secondary check exercising the tiled path: multiple L blocks with a
    # partial trailing block, flattened-row axis not a multiple of 8, bf16
    # (16-row sublane packing path).
    N2, C2, L2 = 3, 5, 300
    chomp2 = 44
    x2 = jax.random.normal(jax.random.PRNGKey(1), (N2, C2, L2),
                           dtype=jnp.bfloat16)
    y2 = jax.block_until_ready(chomp1d(x2, chomp2))
    assert jnp.array_equal(y2, x2[:, :, :-chomp2]), "tiled-path mismatch (bf16)"

    print("KERNEL_OK")
</pallas_src>

<mosaic_0001>
module attributes {stable_mosaic.version = 11 : i64} {
  func.func @_chomp_copy_kernel(%arg0: i32, %arg1: i32, %arg2: memref<8x128xf32, #tpu.memory_space<vmem>>, %arg3: memref<8x128xf32, #tpu.memory_space<vmem>>) attributes {dimension_semantics = [#tpu.dimension_semantics<parallel>, #tpu.dimension_semantics<parallel>], iteration_bounds = array<i64: 1, 1>, scalar_prefetch = 0 : i64, scratch_operands = 0 : i64, tpu.core_type = #tpu.core_type<tc>, window_params = [{transform_indices = @transform_0, window_bounds = array<i64: 8, 128>}, {transform_indices = @transform_1, window_bounds = array<i64: 8, 128>}]} {
    %c0 = arith.constant 0 : index
    %c0_0 = arith.constant 0 : index
    %0 = vector.load %arg2[%c0, %c0_0] : memref<8x128xf32, #tpu.memory_space<vmem>>, vector<8x128xf32>
    %c0_1 = arith.constant 0 : index
    %c0_2 = arith.constant 0 : index
    %1 = vector.load %arg3[%c0_1, %c0_2] : memref<8x128xf32, #tpu.memory_space<vmem>>, vector<8x128xf32>
    tpu.vector_store %arg3[%c0_1, %c0_2], %0 {strides = array<i32>} : memref<8x128xf32, #tpu.memory_space<vmem>>, vector<8x128xf32>,
    return
  }
  func.func @transform_0(%arg0: i32, %arg1: i32) -> (i32, i32) {
    %c0_i32 = arith.constant 0 : i32
    return %arg0, %arg1 : i32, i32
  }
  func.func @transform_1(%arg0: i32, %arg1: i32) -> (i32, i32) {
    %c0_i32 = arith.constant 0 : i32
    return %arg0, %arg1 : i32, i32
  }
}

</mosaic_0001>

<bundles_post_ra>
// kernel: tpu_custom_call.1
= control target key start
LH: loop header
LB: loop body
LE: loop exit
PB: predicated region body
PF: predicated region fallthrough
CT: control target
= control target key end

     0   :  { %6 = vsyncpa [#allocation3], 0  ;;  %s124_s0 = inlined_call_operand.hbm [shape: f32[8,16], index: 0, kind: input, shape index: {}]   ;;  %s125_s1 = inlined_call_operand.hbm [shape: f32[8,13], index: 1, kind: output, shape index: {}]  }
   0x1   :  { %7 = vsyncpa [#allocation4], 0  ;;  %s88_s6 = smov [#allocation2]   ;;  %s40_s10 = scalar_lea.hbm %s124_s0, 128 }
   0x2   :  { %s14_s7 = sshll.u32 %s88_s6, 4  ;;  %p41_p0 = scmp.ne.s32.totalorder %s124_s0, %s40_s10  ;;  %s15_s7 = int_to_ptr.vmem [resolvable:$true] %s14_s7 }
   0x3   :  { %p44_p1 = scmp.lt.u32.totalorder %s40_s10, %s124_s0 }
   0x5   :  { %p46_p2 = pnand %p44_p1, %p41_p0 }
   0x7   :  { %49 = shalt.err (!%p46_p2)
}
   0x8   :  { %s50_s15 = scalar_lea.vmem %s15_s7, 128  ;;  %p55_p4 = scmp.lt.s32.totalorder %s15_s7, %s15_s7 }
   0x9   :  { %p51_p3 = scmp.ne.s32.totalorder %s15_s7, %s50_s15  ;;  %p56_p5 = scmp.lt.s32.totalorder %s50_s15, %s50_s15 }
   0xb   :  { %p57_p6 = por %p56_p5, %p55_p4 }
   0xd   :  { %p58_p7 = pnand %p57_p6, %p51_p3 }
   0xf   :  { %61 = shalt.err (!%p58_p7)
}
  0x10   :  { %17 = dma.hbm_to_vmem [thread:$0]  %s124_s0, 128, %s15_s7, [#allocation3]  }
  0x11   :  { %84 = dma.done.wait [#allocation3], 128  }
  0x12   :  { %85 = vsyncadd [#allocation3], 4294967168  ;;  %s89_s18 = smov [#allocation5]   ;;  %v21_v0 = vld [vmem:[#allocation2] sm:$0xff] }
  0x13   :  { %s29_s19 = sshll.u32 %s89_s18, 4  ;;  %22 = vst [vmem:[#allocation5] sm:$0xff] %v21_v0  ;;  %s30_s19 = int_to_ptr.vmem [resolvable:$true] %s29_s19 }
  0x14   :  { %s62_s20 = scalar_lea.vmem %s30_s19, 128  ;;  %p67_p9 = scmp.lt.s32.totalorder %s30_s19, %s30_s19 }
  0x15   :  { %p63_p8 = scmp.ne.s32.totalorder %s30_s19, %s62_s20  ;;  %p68_p10 = scmp.lt.s32.totalorder %s62_s20, %s62_s20 }
  0x17   :  { %p69_p11 = por %p68_p10, %p67_p9 }
  0x19   :  { %p70_p12 = pnand %p69_p11, %p63_p8 }
  0x1b   :  { %73 = shalt.err (!%p70_p12)
}
  0x1c   :  { %s74_s23 = scalar_lea.hbm %s125_s1, 128 }
  0x1d   :  { %p75_p13 = scmp.ne.s32.totalorder %s125_s1, %s74_s23  ;;  %p78_p0 = scmp.lt.u32.totalorder %s74_s23, %s125_s1 }
  0x1f   :  { %p80_p1 = pnand %p78_p0, %p75_p13 }
  0x21   :  { %83 = shalt.err (!%p80_p1)
}
  0x22   :  { %32 = dma.vmem_to_hbm [thread:$0]  %s30_s19, 128, %s125_s1, [#allocation4]  }
  0x23   :  { %86 = dma.done.wait [#allocation4], 128  }
  0x24   :  { %87 = vsyncadd [#allocation4], 4294967168 }
  0x25   :  { %36 = vsyncpa [#allocation3], 1 }
  0x26   :  { %37 = vsyncpa [#allocation4], 1 }

</bundles_post_ra>
